<compile_context>
chip_gen: v6e
topology: v6e:2x2x1
jax: 0.10.0
libtpu: 0.0.40
codegen_flags: <defaults>
</compile_context>

<pallas_src>
import jax
import jax.numpy as jnp
from jax.experimental import pallas as pl
from jax.experimental.pallas import tpu as pltpu


def _make_param_output_kernel(n_chunks, k_chunk, d2):
    """Builds the kernel with static hidden-dim chunking parameters."""

    def kernel(x_ref, wu_ref, bu_ref, wd_ref, bd_ref, gamma_ref, beta_ref, o_ref):
        x_f32 = x_ref[...].astype(jnp.float32)     # residual / LayerNorm operand (f32)
        x_mx = x_ref[...].astype(wu_ref.dtype)     # MXU operand cast done in-kernel

        c = jnp.float32(0.7978845608028654)        # sqrt(2/pi)
        a = jnp.float32(0.044715)

        def chunk_contrib(start, kc):
            # dense_up chunk on the MXU: (tn, D) @ (D, kc) -> f32 (tn, kc)
            wu_c = wu_ref[:, pl.ds(start, kc)]
            bu_c = bu_ref[:, pl.ds(start, kc)]
            h = jnp.dot(x_mx, wu_c, preferred_element_type=jnp.float32) + bu_c
            # GELU tanh approximation (matches nn.GELU(approximate='tanh')), f32.
            # h*(1 + a*h*h) reuses h*h to shave a VALU op (matters on v5e).
            h2 = h * h
            h = 0.5 * h * (1.0 + jnp.tanh(c * h * (1.0 + a * h2)))
            # dense_down chunk: accumulate in f32.
            wd_c = wd_ref[pl.ds(start, kc), :]
            return jnp.dot(h.astype(wd_ref.dtype), wd_c,
                           preferred_element_type=jnp.float32)

        if n_chunks == 1:
            y = chunk_contrib(0, d2)
        else:
            def body(ci, acc):
                start = pl.multiple_of(ci * k_chunk, k_chunk)
                return acc + chunk_contrib(start, k_chunk)
            y = jax.lax.fori_loop(
                0, n_chunks, body,
                jnp.zeros((x_f32.shape[0], o_ref.shape[-1]), jnp.float32))

        y = y + bd_ref[...]

        # nn.Dropout(0.2) is identity in eval mode; residual (f32 x) then LayerNorm.
        r = y + x_f32
        mean = jnp.mean(r, axis=-1, keepdims=True)
        centered = r - mean
        var = jnp.mean(centered * centered, axis=-1, keepdims=True)
        out = centered * jax.lax.rsqrt(var + 1e-12) * gamma_ref[...] + beta_ref[...]

        o_ref[...] = out.astype(o_ref.dtype)

    return kernel


def prepare_params(w_up, b_up, w_down, b_down, gamma, beta,
                   compute_dtype=jnp.bfloat16):
    """One-time parameter preprocessing, hoisted out of the forward path:
    spectral normalization (divide by the largest singular value), transpose to the
    x @ W^T layout the kernel uses, and cast matmul operands to the MXU dtype.

    TODO(synk): PyTorch's spectral_norm uses power iteration with persistent u/v
    buffers; an exact SVD sigma can differ slightly from a checkpointed module.
    TODO(synk): on v7x, fp8 weight casts here (keeping f32 accumulation) would halve
    resident-weight VMEM and ~double MXU throughput if accuracy allows."""
    sigma_up = jnp.linalg.svd(w_up, compute_uv=False)[0]
    sigma_down = jnp.linalg.svd(w_down, compute_uv=False)[0]
    D2, D = w_up.shape
    return {
        "w_up_t": (w_up / sigma_up).T.astype(compute_dtype),        # (D, 2D)
        "b_up": b_up.reshape(1, D2).astype(jnp.float32),
        "w_down_t": (w_down / sigma_down).T.astype(compute_dtype),  # (2D, D)
        "b_down": b_down.reshape(1, D).astype(jnp.float32),
        "gamma": gamma.reshape(1, D).astype(jnp.float32),
        "beta": beta.reshape(1, D).astype(jnp.float32),
    }


def _round_up(n, m):
    return ((n + m - 1) // m) * m


def _pick_k_chunk(d2, target=1024):
    """Largest multiple-of-128 divisor of D2 that is <= target (bounds the f32 h
    intermediate); falls back to a single chunk when none exists or D2 is small."""
    if d2 <= target:
        return d2, 1
    for kc in range(target - (target % 128), 127, -128):
        if d2 % kc == 0:
            return kc, d2 // kc
    return d2, 1


def _vmem_cap_bytes():
    """Per-chip VMEM budget: physical capacity minus headroom for compiler scratch."""
    cap = None
    try:
        cap = getattr(pltpu.get_tpu_info(), "vmem_capacity_bytes", None)
    except Exception:
        cap = None
    if cap is None:
        cap = 64 * 1024 * 1024           # conservative fallback (valid on v7x too)
    return max(32 * 1024 * 1024, int(cap) - 16 * 1024 * 1024)


def param_output_forward(x, params, *, tile_n=1024, out_dtype=None):
    """x: (B, S, D) float32.  params: output of prepare_params().

    out_dtype defaults to x.dtype; pass jnp.bfloat16 to halve writeback bytes when
    downstream accepts it."""
    B, S, D = x.shape
    N = B * S
    wu = params["w_up_t"]
    D2 = wu.shape[1]
    compute_dtype = wu.dtype
    out_dtype = x.dtype if out_dtype is None else out_dtype

    # NOTE: for real models keep D % 128 == 0 (lane-dense loads/stores, full MXU
    # occupancy); the demo below uses D=128.

    # Row tile: big enough to amortize the ~0.35us per-step pipeline overhead,
    # rounded to 16 rows (bf16 packs two rows per sublane), clamped to the work
    # size.  Only force a >=2-step split when each step keeps a healthy amount of
    # work (dual-TC sharing on v7x; on single-TC v5e/v6e the grid is a serial loop
    # so splitting a single tile would be pure overhead anyway).
    n_pad16 = _round_up(N, 16)
    tn = max(16, min(_round_up(tile_n, 16), n_pad16))
    if n_pad16 // tn < 2 and n_pad16 >= 2 * 256:
        tn = _round_up((n_pad16 + 1) // 2, 16)
    grid = (pl.cdiv(N, tn),)

    # Hidden-dim chunking keeps the f32 h intermediate bounded for large D.
    k_chunk, n_chunks = _pick_k_chunk(D2)

    # x streams in f32 (no wrapper-side astype / pad copies over HBM); a ragged last
    # row tile is handled by Pallas partial-block masking.
    x2d = x.reshape(N, D)

    cdt = jnp.dtype(compute_dtype).itemsize
    odt = jnp.dtype(out_dtype).itemsize
    weight_bytes = (D * D2 + D2 * D) * cdt + (D2 + 3 * D) * 4
    cost = pl.CostEstimate(
        flops=2 * 2 * N * D * D2,            # two (N,D)x(D,2D)-sized matmuls
        transcendentals=N * D2,              # tanh inside the GELU
        bytes_accessed=int(N * D * (4 + odt) + weight_bytes),
    )

    # VMEM budget: double-buffered f32 x tiles + double-buffered out tiles +
    # resident weights + per-chunk f32/bf16 intermediates, with margin; capped to
    # the per-chip physical VMEM minus headroom.
    vmem_est = (2 * tn * D * 4 + 2 * tn * D * odt + weight_bytes
                + tn * k_chunk * 6 + tn * D * (4 + 2 + 8))
    vmem_limit = int(min(max(int(1.5 * vmem_est), 32 * 1024 * 1024),
                         _vmem_cap_bytes()))

    # Grid-invariant operands: whole array resident in VMEM (loaded once, not
    # cycled through the per-step double-buffered window pipeline).
    resident = pl.BlockSpec(memory_space=pltpu.MemorySpace.VMEM)

    out2d = pl.pallas_call(
        _make_param_output_kernel(n_chunks, k_chunk, D2),
        out_shape=jax.ShapeDtypeStruct((N, D), out_dtype),
        grid_spec=pltpu.PrefetchScalarGridSpec(
            num_scalar_prefetch=0,
            grid=grid,
            in_specs=[
                pl.BlockSpec((tn, D), lambda i: (i, 0)),   # x row tile (pipelined, f32)
                resident,                                  # W_up^T   (D, 2D)  bf16
                resident,                                  # b_up     (1, 2D)  f32
                resident,                                  # W_down^T (2D, D)  bf16
                resident,                                  # b_down   (1, D)   f32
                resident,                                  # gamma    (1, D)   f32
                resident,                                  # beta     (1, D)   f32
            ],
            out_specs=pl.BlockSpec((tn, D), lambda i: (i, 0)),
        ),
        compiler_params=pltpu.CompilerParams(
            dimension_semantics=("parallel",),
            vmem_limit_bytes=vmem_limit,
        ),
        cost_estimate=cost,
    )(x2d, wu, params["b_up"], params["w_down_t"], params["b_down"],
      params["gamma"], params["beta"])

    return out2d.reshape(B, S, D)


def _reference(x, w_up, b_up, w_down, b_down, gamma, beta,
               matmul_dtype=jnp.float32):
    """Pure-JAX reference; matmul_dtype mimics the kernel's MXU operand casts while
    the residual / LayerNorm stay f32 (module semantics)."""
    sigma_up = jnp.linalg.svd(w_up, compute_uv=False)[0]
    sigma_down = jnp.linalg.svd(w_down, compute_uv=False)[0]
    wu = (w_up / sigma_up).T.astype(matmul_dtype).astype(jnp.float32)
    wd = (w_down / sigma_down).T.astype(matmul_dtype).astype(jnp.float32)
    x32 = x.astype(jnp.float32)
    xm = x32.astype(matmul_dtype).astype(jnp.float32)
    h = xm @ wu + b_up
    c = jnp.sqrt(2.0 / jnp.pi)
    h = 0.5 * h * (1.0 + jnp.tanh(c * (h + 0.044715 * h ** 3)))
    y = h.astype(matmul_dtype).astype(jnp.float32) @ wd + b_down
    r = y + x32
    mean = jnp.mean(r, axis=-1, keepdims=True)
    var = jnp.mean((r - mean) ** 2, axis=-1, keepdims=True)
    return (r - mean) * jax.lax.rsqrt(var + 1e-12) * gamma + beta


if __name__ == "__main__":
    # D is a multiple of 128 so blocks are lane-dense (unmasked stores, full MXU
    # occupancy) per the perf review; B/S stay small.
    B, S, D = 2, 8, 128
    D2 = 2 * D

    key = jax.random.PRNGKey(0)
    kx, ku, kbu, kd, kbd = jax.random.split(key, 5)

    x = jax.random.normal(kx, (B, S, D), dtype=jnp.float32)

    # Deterministic parameter init mimicking nn.Linear default (uniform +/- 1/sqrt(fan_in)).
    bound_up = 1.0 / jnp.sqrt(D)
    w_up = jax.random.uniform(ku, (D2, D), jnp.float32, -bound_up, bound_up)
    b_up = jax.random.uniform(kbu, (D2,), jnp.float32, -bound_up, bound_up)

    bound_down = 1.0 / jnp.sqrt(D2)
    w_down = jax.random.uniform(kd, (D, D2), jnp.float32, -bound_down, bound_down)
    b_down = jax.random.uniform(kbd, (D,), jnp.float32, -bound_down, bound_down)

    gamma = jnp.ones((D,), jnp.float32)   # LayerNorm default init
    beta = jnp.zeros((D,), jnp.float32)

    # Spectral norm / transpose / bf16 weight cast done ONCE, outside the forward path.
    params = prepare_params(w_up, b_up, w_down, b_down, gamma, beta,
                            compute_dtype=jnp.bfloat16)

    out = param_output_forward(x, params, tile_n=1024)
    out = jax.block_until_ready(out)
    assert out.shape == (B, S, D)
    assert not jnp.any(jnp.isnan(out))

    # Strict check vs a reference that mimics the kernel's bf16 MXU operand casts
    # (residual stays f32 in both, matching the module).
    ref_bf16 = _reference(x, w_up, b_up, w_down, b_down, gamma, beta,
                          matmul_dtype=jnp.bfloat16)
    assert jnp.allclose(out, ref_bf16, atol=2e-3, rtol=2e-3)

    # Looser check vs the pure-f32 module semantics (only bf16 weight/operand
    # rounding in the two matmuls separates them now).
    ref_f32 = _reference(x, w_up, b_up, w_down, b_down, gamma, beta)
    assert jnp.allclose(out, ref_f32, atol=5e-2, rtol=5e-2)

    print("KERNEL_OK")
</pallas_src>

<mosaic_0001>
module attributes {stable_mosaic.version = 11 : i64} {
  func.func @kernel(%arg0: i32, %arg1: memref<16x128xf32, #tpu.memory_space<vmem>>, %arg2: memref<128x256xbf16, #tpu.memory_space<vmem>>, %arg3: memref<1x256xf32, #tpu.memory_space<vmem>>, %arg4: memref<256x128xbf16, #tpu.memory_space<vmem>>, %arg5: memref<1x128xf32, #tpu.memory_space<vmem>>, %arg6: memref<1x128xf32, #tpu.memory_space<vmem>>, %arg7: memref<1x128xf32, #tpu.memory_space<vmem>>, %arg8: memref<16x128xf32, #tpu.memory_space<vmem>>) attributes {dimension_semantics = [#tpu.dimension_semantics<parallel>], iteration_bounds = array<i64: 1>, scalar_prefetch = 0 : i64, scratch_operands = 0 : i64, tpu.core_type = #tpu.core_type<tc>, window_params = [{transform_indices = @transform_0, window_bounds = array<i64: 16, 128>}, {pipeline_mode = #tpu.pipeline_mode<synchronous>, transform_indices = @transform_1, window_bounds = array<i64: 128, 256>}, {pipeline_mode = #tpu.pipeline_mode<synchronous>, transform_indices = @transform_2, window_bounds = array<i64: 1, 256>}, {pipeline_mode = #tpu.pipeline_mode<synchronous>, transform_indices = @transform_3, window_bounds = array<i64: 256, 128>}, {pipeline_mode = #tpu.pipeline_mode<synchronous>, transform_indices = @transform_4, window_bounds = array<i64: 1, 128>}, {pipeline_mode = #tpu.pipeline_mode<synchronous>, transform_indices = @transform_5, window_bounds = array<i64: 1, 128>}, {pipeline_mode = #tpu.pipeline_mode<synchronous>, transform_indices = @transform_6, window_bounds = array<i64: 1, 128>}, {transform_indices = @transform_7, window_bounds = array<i64: 16, 128>}]} {
    %c0 = arith.constant 0 : index
    %c0_0 = arith.constant 0 : index
    %0 = vector.load %arg1[%c0, %c0_0] : memref<16x128xf32, #tpu.memory_space<vmem>>, vector<16x128xf32>
    %c0_1 = arith.constant 0 : index
    %c0_2 = arith.constant 0 : index
    %1 = vector.load %arg1[%c0_1, %c0_2] : memref<16x128xf32, #tpu.memory_space<vmem>>, vector<16x128xf32>
    %2 = arith.truncf %1 : vector<16x128xf32> to vector<16x128xbf16>
    %c0_3 = arith.constant 0 : index
    %c0_4 = arith.constant 0 : index
    %3 = vector.load %arg2[%c0_3, %c0_4] : memref<128x256xbf16, #tpu.memory_space<vmem>>, vector<128x256xbf16>
    %c0_5 = arith.constant 0 : index
    %c0_6 = arith.constant 0 : index
    %4 = vector.load %arg3[%c0_5, %c0_6] : memref<1x256xf32, #tpu.memory_space<vmem>>, vector<1x256xf32>
    %cst = arith.constant dense<0.000000e+00> : vector<16x256xf32>
    %5 = tpu.matmul %2, %3, %cst {dimension_numbers = #tpu.dot_dimension_numbers<[1], [0], [0], [1], [0, 0, 1, 1], [], []>} : vector<16x128xbf16>, vector<128x256xbf16>, vector<16x256xf32> -> vector<16x256xf32>
    %6 = vector.broadcast %4 : vector<1x256xf32> to vector<16x256xf32>
    %7 = arith.addf %5, %6 : vector<16x256xf32>
    %8 = arith.mulf %7, %7 : vector<16x256xf32>
    %cst_7 = arith.constant 5.000000e-01 : f32
    %9 = vector.broadcast %cst_7 : f32 to vector<16x256xf32>
    %10 = arith.mulf %9, %7 : vector<16x256xf32>
    %cst_8 = arith.constant 0.797884583 : f32
    %11 = vector.broadcast %cst_8 : f32 to vector<16x256xf32>
    %12 = arith.mulf %11, %7 : vector<16x256xf32>
    %cst_9 = arith.constant 4.471500e-02 : f32
    %13 = vector.broadcast %cst_9 : f32 to vector<16x256xf32>
    %14 = arith.mulf %13, %8 : vector<16x256xf32>
    %cst_10 = arith.constant 1.000000e+00 : f32
    %15 = vector.broadcast %cst_10 : f32 to vector<16x256xf32>
    %16 = arith.addf %15, %14 : vector<16x256xf32>
    %17 = arith.mulf %12, %16 : vector<16x256xf32>
    %18 = math.tanh %17 : vector<16x256xf32>
    %cst_11 = arith.constant 1.000000e+00 : f32
    %19 = vector.broadcast %cst_11 : f32 to vector<16x256xf32>
    %20 = arith.addf %19, %18 : vector<16x256xf32>
    %21 = arith.mulf %10, %20 : vector<16x256xf32>
    %c0_12 = arith.constant 0 : index
    %c0_13 = arith.constant 0 : index
    %22 = vector.load %arg4[%c0_12, %c0_13] : memref<256x128xbf16, #tpu.memory_space<vmem>>, vector<256x128xbf16>
    %23 = arith.truncf %21 : vector<16x256xf32> to vector<16x256xbf16>
    %cst_14 = arith.constant dense<0.000000e+00> : vector<16x128xf32>
    %24 = tpu.matmul %23, %22, %cst_14 {dimension_numbers = #tpu.dot_dimension_numbers<[1], [0], [0], [1], [0, 0, 1, 1], [], []>} : vector<16x256xbf16>, vector<256x128xbf16>, vector<16x128xf32> -> vector<16x128xf32>
    %c0_15 = arith.constant 0 : index
    %c0_16 = arith.constant 0 : index
    %25 = vector.load %arg5[%c0_15, %c0_16] : memref<1x128xf32, #tpu.memory_space<vmem>>, vector<1x128xf32>
    %26 = vector.broadcast %25 : vector<1x128xf32> to vector<16x128xf32>
    %27 = arith.addf %24, %26 : vector<16x128xf32>
    %28 = arith.addf %27, %0 : vector<16x128xf32>
    %cst_17 = arith.constant dense<0.000000e+00> : vector<16xf32>
    %29 = vector.multi_reduction <add>, %28, %cst_17 [1] : vector<16x128xf32> to vector<16xf32>
    %30 = vector.shape_cast %29 : vector<16xf32> to vector<16x1xf32>
    %cst_18 = arith.constant 1.280000e+02 : f32
    %31 = vector.broadcast %cst_18 : f32 to vector<16x1xf32>
    %32 = arith.divf %30, %31 : vector<16x1xf32>
    %33 = vector.broadcast %32 : vector<16x1xf32> to vector<16x128xf32>
    %34 = arith.subf %28, %33 : vector<16x128xf32>
    %35 = arith.mulf %34, %34 : vector<16x128xf32>
    %cst_19 = arith.constant dense<0.000000e+00> : vector<16xf32>
    %36 = vector.multi_reduction <add>, %35, %cst_19 [1] : vector<16x128xf32> to vector<16xf32>
    %37 = vector.shape_cast %36 : vector<16xf32> to vector<16x1xf32>
    %cst_20 = arith.constant 1.280000e+02 : f32
    %38 = vector.broadcast %cst_20 : f32 to vector<16x1xf32>
    %39 = arith.divf %37, %38 : vector<16x1xf32>
    %cst_21 = arith.constant 9.99999996E-13 : f32
    %40 = vector.broadcast %cst_21 : f32 to vector<16x1xf32>
    %41 = arith.addf %39, %40 : vector<16x1xf32>
    %42 = math.rsqrt %41 : vector<16x1xf32>
    %43 = vector.broadcast %42 : vector<16x1xf32> to vector<16x128xf32>
    %44 = arith.mulf %34, %43 : vector<16x128xf32>
    %c0_22 = arith.constant 0 : index
    %c0_23 = arith.constant 0 : index
    %45 = vector.load %arg6[%c0_22, %c0_23] : memref<1x128xf32, #tpu.memory_space<vmem>>, vector<1x128xf32>
    %46 = vector.broadcast %45 : vector<1x128xf32> to vector<16x128xf32>
    %47 = arith.mulf %44, %46 : vector<16x128xf32>
    %c0_24 = arith.constant 0 : index
    %c0_25 = arith.constant 0 : index
    %48 = vector.load %arg7[%c0_24, %c0_25] : memref<1x128xf32, #tpu.memory_space<vmem>>, vector<1x128xf32>
    %49 = vector.broadcast %48 : vector<1x128xf32> to vector<16x128xf32>
    %50 = arith.addf %47, %49 : vector<16x128xf32>
    %c0_26 = arith.constant 0 : index
    %c0_27 = arith.constant 0 : index
    %51 = vector.load %arg8[%c0_26, %c0_27] : memref<16x128xf32, #tpu.memory_space<vmem>>, vector<16x128xf32>
    tpu.vector_store %arg8[%c0_26, %c0_27], %50 {strides = array<i32>} : memref<16x128xf32, #tpu.memory_space<vmem>>, vector<16x128xf32>,
    return
  }
  func.func @transform_0(%arg0: i32) -> (i32, i32) {
    %c0_i32 = arith.constant 0 : i32
    %c0_i32_0 = arith.constant 0 : i32
    return %arg0, %c0_i32 : i32, i32
  }
  func.func @transform_1(%arg0: i32) -> (i32, i32) {
    %c0_i32 = arith.constant 0 : i32
    %c0_i32_0 = arith.constant 0 : i32
    %c0_i32_1 = arith.constant 0 : i32
    return %c0_i32, %c0_i32_0 : i32, i32
  }
  func.func @transform_2(%arg0: i32) -> (i32, i32) {
    %c0_i32 = arith.constant 0 : i32
    %c0_i32_0 = arith.constant 0 : i32
    %c0_i32_1 = arith.constant 0 : i32
    return %c0_i32, %c0_i32_0 : i32, i32
  }
  func.func @transform_3(%arg0: i32) -> (i32, i32) {
    %c0_i32 = arith.constant 0 : i32
    %c0_i32_0 = arith.constant 0 : i32
    %c0_i32_1 = arith.constant 0 : i32
    return %c0_i32, %c0_i32_0 : i32, i32
  }
  func.func @transform_4(%arg0: i32) -> (i32, i32) {
    %c0_i32 = arith.constant 0 : i32
    %c0_i32_0 = arith.constant 0 : i32
    %c0_i32_1 = arith.constant 0 : i32
    return %c0_i32, %c0_i32_0 : i32, i32
  }
  func.func @transform_5(%arg0: i32) -> (i32, i32) {
    %c0_i32 = arith.constant 0 : i32
    %c0_i32_0 = arith.constant 0 : i32
    %c0_i32_1 = arith.constant 0 : i32
    return %c0_i32, %c0_i32_0 : i32, i32
  }
  func.func @transform_6(%arg0: i32) -> (i32, i32) {
    %c0_i32 = arith.constant 0 : i32
    %c0_i32_0 = arith.constant 0 : i32
    %c0_i32_1 = arith.constant 0 : i32
    return %c0_i32, %c0_i32_0 : i32, i32
  }
  func.func @transform_7(%arg0: i32) -> (i32, i32) {
    %c0_i32 = arith.constant 0 : i32
    %c0_i32_0 = arith.constant 0 : i32
    return %arg0, %c0_i32 : i32, i32
  }
}

</mosaic_0001>

<bundles_post_ra>
// kernel: tpu_custom_call.1
= control target key start
LH: loop header
LB: loop body
LE: loop exit
PB: predicated region body
PF: predicated region fallthrough
CT: control target
= control target key end

     0   :  { %12 = vsyncpa [#allocation3], 0  ;;  %s794_s0 = inlined_call_operand.hbm [shape: f32[16,128], index: 0, kind: input, shape index: {}]   ;;  %s795_s1 = inlined_call_operand.hbm [shape: bf16[128,256], index: 1, kind: input, shape index: {}]   ;;  %s796_s2 = inlined_call_operand.vmem [shape: f32[1,256], index: 2, kind: input, shape index: {}]   ;;  %s797_s3 = inlined_call_operand.hbm [shape: bf16[256,128], index: 3, kind: input, shape index: {}]   ;;  %s798_s4 = inlined_call_operand.vmem [shape: f32[1,128], index: 4, kind: input, shape index: {}]   ;;  %s799_s5 = inlined_call_operand.vmem [shape: f32[1,128], index: 5, kind: input, shape index: {}]   ;;  %s800_s6 = inlined_call_operand.vmem [shape: f32[1,128], index: 6, kind: input, shape index: {}]   ;;  %s801_s7 = inlined_call_operand.hbm [shape: f32[16,128], index: 7, kind: output, shape index: {}]  }
   0x1   :  { %13 = vsyncpa [#allocation6], 0 }
   0x2   :  { %14 = vsyncpa [#allocation4], 0  ;;  %s704_s24 = smov [#allocation5]   ;;  %s705_s26 = smov [#allocation2]  }
   0x3   :  { %s32_s25 = sshll.u32 %s704_s24, 4  ;;  %s20_s27 = sshll.u32 %s705_s26, 4  ;;  %s33_s25 = int_to_ptr.vmem [resolvable:$true] %s32_s25  ;;  %s21_s27 = int_to_ptr.vmem [resolvable:$true] %s20_s27 }
   0x4   :  { %s626_s28 = scalar_lea.vmem %s33_s25, 2048  ;;  %p631_p1 = scmp.lt.s32.totalorder %s33_s25, %s33_s25 }
   0x5   :  { %p627_p0 = scmp.ne.s32.totalorder %s33_s25, %s626_s28  ;;  %p632_p2 = scmp.lt.s32.totalorder %s626_s28, %s626_s28 }
   0x7   :  { %p633_p3 = por %p632_p2, %p631_p1 }
   0x9   :  { %p634_p4 = pnand %p633_p3, %p627_p0 }
   0xb   :  { %637 = shalt.err (!%p634_p4)
}
   0xc   :  { %s706_s29 = smov 128   ;;  %s707_s30 = smov 8  }
   0xd   :  { %38 = dma.hbm_to_vmem [thread:$0]  %s795_s1, 2048, %s33_s25, [#allocation6], %s706_s29, %s706_s29, %s707_s30  }
   0xe   :  { %s646_s10 = scalar_lea.vmem %s21_s27, 256  ;;  %p651_p6 = scmp.lt.s32.totalorder %s21_s27, %s21_s27 }
   0xf   :  { %p647_p5 = scmp.ne.s32.totalorder %s21_s27, %s646_s10  ;;  %p652_p7 = scmp.lt.s32.totalorder %s646_s10, %s646_s10 }
  0x11   :  { %p653_p8 = por %p652_p7, %p651_p6 }
  0x13   :  { %p654_p9 = pnand %p653_p8, %p647_p5 }
  0x15   :  { %657 = shalt.err (!%p654_p9)
}
  0x16   :  { %26 = dma.hbm_to_vmem [thread:$0]  %s794_s0, 256, %s21_s27, [#allocation3], %s706_s29, %s706_s29, %s707_s30  }
  0x17   :  { %s708_s13 = smov [#allocation7]  }
  0x18   :  { %s46_s14 = sshll.u32 %s708_s13, 4  ;;  %s47_s14 = int_to_ptr.vmem [resolvable:$true] %s46_s14 }
  0x19   :  { %s666_s15 = scalar_lea.vmem %s47_s14, 2048  ;;  %p671_p11 = scmp.lt.s32.totalorder %s47_s14, %s47_s14 }
  0x1a   :  { %p667_p10 = scmp.ne.s32.totalorder %s47_s14, %s666_s15  ;;  %p672_p12 = scmp.lt.s32.totalorder %s666_s15, %s666_s15 }
  0x1c   :  { %p673_p13 = por %p672_p12, %p671_p11 }
  0x1e   :  { %p674_p0 = pnand %p673_p13, %p667_p10 }
  0x20   :  { %677 = shalt.err (!%p674_p0)
}
  0x21   :  { %s709_s1 = smov 64   ;;  %s710_s16 = smov 4  }
  0x22   :  { %52 = dma.hbm_to_vmem [thread:$0]  %s797_s3, 2048, %s47_s14, [#allocation6], %s709_s1, %s709_s1, %s710_s16  }
  0x23   :  { %698 = dma.done.wait [#allocation3], 256  }
  0x24   :  { %699 = vsyncadd [#allocation3], 4294967040 }
  0x25   :  { %700 = dma.done.wait [#allocation6], 4096  }
  0x26   :  { %701 = vsyncadd [#allocation6], 4294963200  ;;  %v711_v0 = vmov 0   ;;  %v566_v1 = vld [vmem:[#allocation5 + $0x74] ss:$8 sps:$4 sm:$0xff]   ;;  %v594_v24 = vld [vmem:[#allocation7 + $0x68] sm:$0xff]   ;;  %v90_v36 = vlaneseq }
  0x27   :  { %212 = vmatprep.mubr.bf16.mxu0 %v711_v0  ;;  %v568_v2 = vld [vmem:[#allocation5 + $0x70] ss:$8 sps:$4 sm:$0xff]   ;;  %180 = vmatprep.subr.bf16.mxu0 %v566_v1  ;;  %v569_v3 = vld [vmem:[#allocation5 + $0x64] ss:$8 sps:$4 sm:$0xff]   ;;  %v571_v4 = vld [vmem:[#allocation5 + $0x60] ss:$8 sps:$4 sm:$0xff]  }
  0x28   :  { %181 = vmatpush1.bf16.msra.mxu0 %v568_v2  ;;  %v572_v5 = vld [vmem:[#allocation5 + $0x54] ss:$8 sps:$4 sm:$0xff]   ;;  %v574_v6 = vld [vmem:[#allocation5 + $0x50] ss:$8 sps:$4 sm:$0xff]   ;;  %v575_v7 = vld [vmem:[#allocation5 + $0x44] ss:$8 sps:$4 sm:$0xff]  }
  0x29   :  { %182 = vmatprep.subr.bf16.mxu0 %v569_v3  ;;  %v577_v8 = vld [vmem:[#allocation5 + $0x40] ss:$8 sps:$4 sm:$0xff]   ;;  %v578_v9 = vld [vmem:[#allocation5 + $0x34] ss:$8 sps:$4 sm:$0xff]   ;;  %v580_v10 = vld [vmem:[#allocation5 + $0x30] ss:$8 sps:$4 sm:$0xff]  }
  0x2a   :  { %v581_v11 = vld [vmem:[#allocation5 + $0x24] ss:$8 sps:$4 sm:$0xff]   ;;  %v583_v12 = vld [vmem:[#allocation5 + $0x20] ss:$8 sps:$4 sm:$0xff]   ;;  %v584_v13 = vld [vmem:[#allocation5 + $0x14] ss:$8 sps:$4 sm:$0xff]  }
  0x2b   :  { %v586_v14 = vld [vmem:[#allocation5 + $0x10] ss:$8 sps:$4 sm:$0xff]   ;;  %v587_v15 = vld [vmem:[#allocation5 + $0x4] ss:$8 sps:$4 sm:$0xff]   ;;  %v589_v16 = vld [vmem:[#allocation5] ss:$8 sps:$4 sm:$0xff]  }
  0x2c   :  { %183 = vmatpush1.bf16.msra.mxu0 %v571_v4  ;;  %v768_v17 = vld [vmem:[#allocation2] sm:$0xff]  ;;  %v770_v18 = vld [vmem:[#allocation2 + $0x8] sm:$0xff]  ;;  %v595_v25 = vld [vmem:[#allocation7 + $0x28] sm:$0xff]   ;;  %v91_v37 = vshrl.u32 %v90_v36, 7  ;;  %s712_s23 = smov [#allocation8]  }
  0x2d   :  { %184 = vmatprep.subr.bf16.mxu0 %v572_v5  ;;  %v71_v19 = vpack.c.bf16 %v770_v18, %v768_v17  ;;  %v590_v20 = vld [vmem:[#allocation7 + $0x78] sm:$0xff]   ;;  %v592_v22 = vld [vmem:[#allocation7 + $0x70] sm:$0xff]   ;;  %v596_v26 = vld [vmem:[#allocation7 + $0x60] sm:$0xff]   ;;  %s487_s24 = sshll.u32 %s712_s23, 4  ;;  %s488_s24 = int_to_ptr.vmem [resolvable:$true] %s487_s24 }
  0x2e   :  { %v591_v21 = vld [vmem:[#allocation7 + $0x38] sm:$0xff]   ;;  %535 = vmatprep.subr.bf16.mxu1 %v590_v20  ;;  %v593_v23 = vld [vmem:[#allocation7 + $0x30] sm:$0xff]   ;;  %v597_v27 = vld [vmem:[#allocation7 + $0x20] sm:$0xff]   ;;  %v92_v38 = vsub.s32 0, %v91_v37  ;;  %v96_v40 = vsub.s32 1, %v91_v37  ;;  %s678_s25 = scalar_lea.vmem %s488_s24, 256  ;;  %p683_p2 = scmp.lt.s32.totalorder %s488_s24, %s488_s24 }
  0x2f   :  { %536 = vmatpush3.bf16.msra.mxu1 %v591_v21  ;;  %v598_v28 = vld [vmem:[#allocation7 + $0x58] sm:$0xff]   ;;  %v600_v30 = vld [vmem:[#allocation7 + $0x50] sm:$0xff]   ;;  %v602_v32 = vld [vmem:[#allocation7 + $0x48] sm:$0xff]   ;;  %p679_p1 = scmp.ne.s32.totalorder %s488_s24, %s678_s25  ;;  %p684_p3 = scmp.lt.s32.totalorder %s678_s25, %s678_s25 }
  0x30   :  { %185 = vmatpush1.bf16.msra.mxu0 %v574_v6  ;;  %537 = vmatprep.subr.bf16.mxu1 %v592_v22  ;;  %v599_v29 = vld [vmem:[#allocation7 + $0x18] sm:$0xff]   ;;  %v601_v31 = vld [vmem:[#allocation7 + $0x10] sm:$0xff]   ;;  %v603_v33 = vld [vmem:[#allocation7 + $0x8] sm:$0xff]  }
  0x31   :  { %186 = vmatprep.subr.bf16.mxu0 %v575_v7  ;;  %v604_v34 = vld [vmem:[#allocation7 + $0x40] sm:$0xff]   ;;  %v88_v39 = vld [vmem:[%s796_s2] sm:$0x3]  ;;  %p685_p4 = por %p684_p3, %p683_p2 }
  0x32   :  { %v605_v35 = vld [vmem:[#allocation7] sm:$0xff]   ;;  %v93_v41 = vrot.slane %v88_v39, %v92_v38  ;;  %v97_v42 = vrot.slane %v88_v39, %v96_v40 }
  0x33   :  { %538 = vmatpush3.bf16.msra.mxu1 %v593_v23  ;;  %p686_p5 = pnand %p685_p4, %p679_p1 }
  0x34   :  { %187 = vmatpush1.bf16.msra.mxu0 %v577_v8  ;;  %539 = vmatprep.subr.bf16.mxu1 %v594_v24 }
  0x35   :  { %188 = vmatprep.subr.bf16.mxu0 %v578_v9 }
  0x37   :  { %540 = vmatpush3.bf16.msra.mxu1 %v595_v25 }
  0x38   :  { %189 = vmatpush1.bf16.msra.mxu0 %v580_v10  ;;  %541 = vmatprep.subr.bf16.mxu1 %v596_v26 }
  0x39   :  { %190 = vmatprep.subr.bf16.mxu0 %v581_v11 }
  0x3b   :  { %542 = vmatpush3.bf16.msra.mxu1 %v597_v27 }
  0x3c   :  { %191 = vmatpush1.bf16.msra.mxu0 %v583_v12  ;;  %543 = vmatprep.subr.bf16.mxu1 %v598_v28  ;;  %v516_v28 = vld [vmem:[%s798_s4] ss:$0 sm:$0xff] }
  0x3d   :  { %192 = vmatprep.subr.bf16.mxu0 %v584_v13 }
  0x3f   :  { %544 = vmatpush3.bf16.msra.mxu1 %v599_v29 }
  0x40   :  { %193 = vmatpush1.bf16.msra.mxu0 %v586_v14  ;;  %545 = vmatprep.subr.bf16.mxu1 %v600_v30 }
  0x41   :  { %194 = vmatprep.subr.bf16.mxu0 %v587_v15 }
  0x43   :  { %546 = vmatpush3.bf16.msra.mxu1 %v601_v31 }
  0x44   :  { %195 = vmatpush1.bf16.msra.mxu0 %v589_v16  ;;  %547 = vmatprep.subr.bf16.mxu1 %v602_v32 }
  0x47   :  { %213 = vmatmul.mubr.bf16.vlgmr.msra.gmra.mxu0 %v71_v19  ;;  %548 = vmatpush3.bf16.msra.mxu1 %v603_v33 }
  0x48   :  { %549 = vmatprep.subr.bf16.mxu1 %v604_v34 }
  0x4b   :  { %550 = vmatpush3.bf16.msra.mxu1 %v605_v35 }
 0x107   :  { %v214_v43 = vpop.f32.mrf.mxu0 }
 0x108   :  { %v215_v44 = vadd.f32 %v214_v43, %v93_v41 }
 0x109   :  { %v216_v45 = vpop.f32.mrf.mxu0 }
 0x10a   :  { %v223_v46 = vmul.f32 %v215_v44, %v215_v44  ;;  %v217_v47 = vadd.f32 %v216_v45, %v97_v42  ;;  %v231_v53 = vmul.f32 0.7978846, %v215_v44  ;;  %v227_v20 = vmul.f32 0.5, %v215_v44 }
 0x10b   :  { %v218_v48 = vpop.f32.mrf.mxu0 }
 0x10c   :  { %v235_v49 = vmul.f32 0.044715, %v223_v46  ;;  %v224_v50 = vmul.f32 %v217_v47, %v217_v47  ;;  %v219_v51 = vadd.f32 %v218_v48, %v93_v41  ;;  %v232_v59 = vmul.f32 0.7978846, %v217_v47 }
 0x10d   :  { %v220_v52 = vpop.f32.mrf.mxu0  ;;  %v228_v15 = vmul.f32 0.5, %v217_v47 }
 0x10e   :  { %v239_v54 = vadd.f32 1.0, %v235_v49  ;;  %v236_v55 = vmul.f32 0.044715, %v224_v50  ;;  %v225_v56 = vmul.f32 %v219_v51, %v219_v51  ;;  %v221_v57 = vadd.f32 %v220_v52, %v97_v42 }
 0x10f   :  { %v233_v0 = vmul.f32 0.7978846, %v219_v51  ;;  %v229_v13 = vmul.f32 0.5, %v219_v51  ;;  %v533_v51 = vld [vmem:[%s799_s5] ss:$0 sm:$0xff] }
 0x110   :  { %v243_v58 = vmul.f32 %v239_v54, %v231_v53  ;;  %v240_v60 = vadd.f32 1.0, %v236_v55  ;;  %v237_v61 = vmul.f32 0.044715, %v225_v56  ;;  %v226_v62 = vmul.f32 %v221_v57, %v221_v57  ;;  %v534_v53 = vld [vmem:[%s800_s6] ss:$0 sm:$0xff] }
 0x111   :  { %v234_v4 = vmul.f32 0.7978846, %v221_v57  ;;  %v230_v16 = vmul.f32 0.5, %v221_v57 }
 0x112   :  { %v244_v63 = vmul.f32 %v240_v60, %v232_v59  ;;  %v241_v1 = vadd.f32 1.0, %v237_v61  ;;  %v238_v2 = vmul.f32 0.044715, %v226_v62  ;;  %606 = vtanh.f32 %v243_v58 }
 0x114   :  { %v245_v3 = vmul.f32 %v241_v1, %v233_v0  ;;  %v242_v5 = vadd.f32 1.0, %v238_v2  ;;  %608 = vtanh.f32 %v244_v63 }
 0x116   :  { %610 = vtanh.f32 %v245_v3  ;;  %v246_v6 = vmul.f32 %v242_v5, %v234_v4 }
 0x118   :  { %612 = vtanh.f32 %v246_v6 }
 0x11f   :  { %v607_v7 = vpop.eup %606 }
 0x120   :  { %v251_v14 = vadd.f32 1.0, %v607_v7 }
 0x121   :  { %v609_v8 = vpop.eup %608 }
 0x122   :  { %v252_v11 = vadd.f32 1.0, %v609_v8  ;;  %v255_v24 = vmul.f32 %v251_v14, %v227_v20 }
 0x123   :  { %v611_v9 = vpop.eup %610 }
 0x124   :  { %v253_v10 = vadd.f32 1.0, %v611_v9  ;;  %v256_v22 = vmul.f32 %v252_v11, %v228_v15 }
 0x125   :  { %v613_v12 = vpop.eup %612 }
 0x126   :  { %v254_v19 = vadd.f32 1.0, %v613_v12  ;;  %v257_v21 = vmul.f32 %v253_v10, %v229_v13 }
 0x128   :  { %v258_v23 = vmul.f32 %v254_v19, %v230_v16  ;;  %v291_v26 = vpack.c.bf16 %v257_v21, %v255_v24 }
 0x12a   :  { %v292_v25 = vpack.c.bf16 %v258_v23, %v256_v22 }
 0x12c   :  { %428 = vmatprep.mubr.bf16.mxu1 %v292_v25 }
 0x12d   :  { %429 = vmatmul.mubr.bf16.vlgmr.msra.gmra.mxu1 %v291_v26 }
 0x1ed   :  { %v551_v27 = vpop.f32.mrf.mxu1 }
 0x1ef   :  { %v552_v29 = vpop.f32.mrf.mxu1 }
 0x1f0   :  { %v553_v30 = vadd.f32 %v552_v29, %v551_v27 }
 0x1f1   :  { %v554_v31 = vpop.f32.mrf.mxu1 }
 0x1f2   :  { %v431_v32 = vadd.f32 %v553_v30, %v516_v28 }
 0x1f3   :  { %v555_v33 = vpop.f32.mrf.mxu1 }
 0x1f4   :  { %v556_v34 = vadd.f32 %v555_v33, %v554_v31  ;;  %v437_v35 = vadd.f32 %v431_v32, %v768_v17 }
 0x1f6   :  { %v434_v36 = vadd.f32 %v556_v34, %v516_v28  ;;  %439 = vadd.xlane.f32.xlu0 %v437_v35 }
 0x1f8   :  { %v438_v37 = vadd.f32 %v434_v36, %v770_v18 }
 0x1fa   :  { %441 = vadd.xlane.f32.xlu0 %v438_v37 }
 0x27f   :  { %v440_v38 = vpop.xlane.xlu0 %439 }
 0x280   :  { %v444_v39 = vmul.f32 0.0078125, %v440_v38 }
 0x282   :  { %v446_v40 = vsub.f32 %v437_v35, %v444_v39 }
 0x283   :  { %v442_v41 = vpop.xlane.xlu0 %441 }
 0x284   :  { %v445_v42 = vmul.f32 0.0078125, %v442_v41  ;;  %v448_v43 = vmul.f32 %v446_v40, %v446_v40 }
 0x286   :  { %v447_v44 = vsub.f32 %v438_v37, %v445_v42  ;;  %450 = vadd.xlane.f32.xlu1 %v448_v43 }
 0x288   :  { %v449_v45 = vmul.f32 %v447_v44, %v447_v44 }
 0x28a   :  { %452 = vadd.xlane.f32.xlu1 %v449_v45 }
 0x30f   :  { %v451_v46 = vpop.xlane.xlu1 %450 }
 0x310   :  { %v454_v47 = vmul.f32 0.0078125, %v451_v46 }
 0x312   :  { %v456_v48 = vadd.f32 1e-12, %v454_v47 }
 0x313   :  { %v453_v49 = vpop.xlane.xlu1 %452 }
 0x314   :  { %614 = vrsqrt.f32 %v456_v48  ;;  %v455_v17 = vmul.f32 0.0078125, %v453_v49 }
 0x316   :  { %v457_v50 = vadd.f32 1e-12, %v455_v17 }
 0x318   :  { %616 = vrsqrt.f32 %v457_v50 }
 0x321   :  { %v615_v18 = vpop.eup %614 }
 0x322   :  { %v460_v52 = vmul.f32 %v615_v18, %v446_v40 }
 0x324   :  { %v469_v54 = vmul.f32 %v533_v51, %v460_v52 }
 0x325   :  { %v617_v55 = vpop.eup %616 }
 0x326   :  { %v461_v56 = vmul.f32 %v617_v55, %v447_v44  ;;  %v478_v57 = vadd.f32 %v534_v53, %v469_v54 }
 0x328   :  { %v470_v58 = vmul.f32 %v533_v51, %v461_v56  ;;  %480 = vst [vmem:[#allocation8] sm:$0xff] %v478_v57 }
 0x32a   :  { %v479_v59 = vadd.f32 %v534_v53, %v470_v58 }
 0x32c   :  { %481 = vst [vmem:[#allocation8 + $0x8] sm:$0xff] %v479_v59 }
 0x32d   :  { %689 = shalt.err (!%p686_p5)
}
 0x32e   :  { %493 = dma.vmem_to_hbm [thread:$0]  %s488_s24, 256, %s801_s7, [#allocation4], %s706_s29, %s706_s29, %s707_s30  }
 0x32f   :  { %702 = dma.done.wait [#allocation4], 256  }
 0x330   :  { %703 = vsyncadd [#allocation4], 4294967040 }
 0x331   :  { %497 = vsyncpa [#allocation3], 1 }
 0x332   :  { %498 = vsyncpa [#allocation6], 1 }
 0x333   :  { %499 = vsyncpa [#allocation4], 1 }

</bundles_post_ra>
